<compile_context>
chip_gen: v7x
topology: tpu7x:2x2x1
jax: 0.10.0
libtpu: 0.0.40
codegen_flags: <defaults>
</compile_context>

<pallas_src>
import functools

import jax
import jax.numpy as jnp
from jax.experimental import pallas as pl
from jax.experimental.pallas import tpu as pltpu

EPS = 1e-5                                 # nn.BatchNorm1d default eps
_VMEM_LIMIT_BYTES = 48 * 1024 * 1024       # raised scoped-VMEM cap (fits v7x)
_RESIDENT_SLAB_BYTES = 12 * 1024 * 1024    # budget for the resident z1 slab


def _round_up(x, m):
    return ((x + m - 1) // m) * m


# ---------------------------------------------------------------------------
# Pass 1: per-feature BatchNorm statistics (mean, inv_std) for z1 and z2.
# grid = (D_pad // TD1, N_pad // TN1); batch axis last ("arbitrary").
# Zero-padded batch rows contribute 0 to the sums; we divide by the real N.
# ---------------------------------------------------------------------------
def _bn_stats_kernel(z1_ref, z2_ref, mu1_ref, istd1_ref, mu2_ref, istd2_ref,
                     s1_acc, q1_acc, s2_acc, q2_acc, *, n_real):
    k = pl.program_id(1)

    @pl.when(k == 0)
    def _init():
        s1_acc[...] = jnp.zeros_like(s1_acc)
        q1_acc[...] = jnp.zeros_like(q1_acc)
        s2_acc[...] = jnp.zeros_like(s2_acc)
        q2_acc[...] = jnp.zeros_like(q2_acc)

    z1 = z1_ref[...].astype(jnp.float32)
    z2 = z2_ref[...].astype(jnp.float32)
    s1_acc[...] += jnp.sum(z1, axis=0, keepdims=True)
    q1_acc[...] += jnp.sum(z1 * z1, axis=0, keepdims=True)
    s2_acc[...] += jnp.sum(z2, axis=0, keepdims=True)
    q2_acc[...] += jnp.sum(z2 * z2, axis=0, keepdims=True)

    @pl.when(k == pl.num_programs(1) - 1)
    def _finalize():
        inv_n = 1.0 / n_real
        mu1 = s1_acc[...] * inv_n
        mu2 = s2_acc[...] * inv_n
        var1 = jnp.maximum(q1_acc[...] * inv_n - mu1 * mu1, 0.0)
        var2 = jnp.maximum(q2_acc[...] * inv_n - mu2 * mu2, 0.0)
        mu1_ref[...] = mu1
        istd1_ref[...] = jax.lax.rsqrt(var1 + EPS)
        mu2_ref[...] = mu2
        istd2_ref[...] = jax.lax.rsqrt(var2 + EPS)


# ---------------------------------------------------------------------------
# Pass 2: one (TD, TD) tile of c = zn1.T @ zn2 / N and its loss contribution.
# grid = (D_pad // TD, D_pad // TD, N_pad // TN); batch axis last.
# ---------------------------------------------------------------------------
def _bt_corr_kernel(z1_ref, z2_ref, mu1_ref, istd1_ref, mu2_ref, istd2_ref,
                    out_ref, g_acc, *, lambda_bt, n_real, d_real, tn, td,
                    mxu_dtype, z1_resident, has_row_pad):
    i = pl.program_id(0)
    j = pl.program_id(1)
    k = pl.program_id(2)
    nk = pl.num_programs(2)

    @pl.when(k == 0)
    def _init():
        g_acc[...] = jnp.zeros_like(g_acc)

    # z1 either arrives as a resident (N_pad, TD) slab (fetched once per i) or
    # as a streamed (TN, TD) tile; either way we work on the current k-chunk.
    if z1_resident:
        z1_tile = z1_ref[pl.ds(pl.multiple_of(k * tn, tn), tn), :]
    else:
        z1_tile = z1_ref[...]

    # On-the-fly BatchNorm of the streamed tiles (row-vector broadcast across
    # sublanes: the cheap direction).
    zn1 = (z1_tile.astype(jnp.float32) - mu1_ref[...]) * istd1_ref[...]
    zn2 = (z2_ref[...].astype(jnp.float32) - mu2_ref[...]) * istd2_ref[...]
    zn2_m = zn2.astype(mxu_dtype)

    def _accumulate(z1_op):
        g_acc[...] += jax.lax.dot_general(
            z1_op.astype(mxu_dtype), zn2_m,
            dimension_numbers=(((0,), (0,)), ((), ())),
            preferred_element_type=jnp.float32)

    if not has_row_pad:
        # N needed no padding -> never mask (saves iota/compare/select).
        _accumulate(zn1)
    else:
        # Only the last k tile can contain zero-padded batch rows; gate the
        # mask behind pl.when so steady-state steps pay nothing for it.
        @pl.when(k != nk - 1)
        def _steady():
            _accumulate(zn1)

        @pl.when(k == nk - 1)
        def _tail():
            row = jax.lax.broadcasted_iota(jnp.int32, (tn, td), 0) + k * tn
            _accumulate(jnp.where(row < n_real, zn1, 0.0))

    @pl.when(k == nk - 1)
    def _finalize():
        c = g_acc[...] * (1.0 / n_real)                  # (TD, TD)
        # Off-diagonal weighting applied to everything; padded feature columns
        # produce c == 0, so they are automatically neutral here.
        tile_sum = lambda_bt * jnp.sum(c * c)
        out_ref[0, 0, 0, 0] = tile_sum

        # Only tiles on the block diagonal carry true diagonal entries:
        # replace lambda*c_dd^2 with (c_dd - 1)^2 there (skip feature padding).
        @pl.when(i == j)
        def _diag():
            r = jax.lax.broadcasted_iota(jnp.int32, (td, td), 0)
            q = jax.lax.broadcasted_iota(jnp.int32, (td, td), 1)
            on_diag = (r == q) & ((i * td + r) < d_real)
            corr = jnp.where(on_diag, (c - 1.0) ** 2 - lambda_bt * c * c, 0.0)
            out_ref[0, 0, 0, 0] = tile_sum + jnp.sum(corr)


# ---------------------------------------------------------------------------
# Wrapper
# ---------------------------------------------------------------------------
def bt_loss(z1, z2, lambda_bt, *, mxu_dtype=None):
    """Barlow Twins loss; z1, z2: (N, D) float arrays."""
    assert z1.shape == z2.shape and z1.ndim == 2
    n, d = z1.shape
    if mxu_dtype is None:
        # Accuracy-first default: match the input dtype.  For peak throughput
        # on bf16-native MXUs (v6e/v7x) pass mxu_dtype=jnp.bfloat16 explicitly
        # (f32 accumulation is kept); expect looser tolerances as D grows.
        mxu_dtype = jnp.bfloat16 if z1.dtype == jnp.bfloat16 else jnp.float32
    mxu_dtype = jnp.dtype(mxu_dtype)

    # ---- pass-2 feature tiling (TD) ---------------------------------------
    if d <= 512:
        td, d_pad = d, d                      # single full-width feature tile
    elif d % 1024 == 0:
        td, d_pad = 1024, d
    else:
        td, d_pad = 512, _round_up(d, 512)

    # ---- pass-2 batch (contraction) tiling (TN) ----------------------------
    if n <= 512:
        tn = _round_up(n, 16)
        n_pad = tn
    else:
        tn = 512
        n_pad = _round_up(n, tn)
    has_row_pad = n_pad != n

    if (n_pad, d_pad) != (n, d):
        z1 = jnp.pad(z1, ((0, n_pad - n), (0, d_pad - d)))
        z2 = jnp.pad(z2, ((0, n_pad - n), (0, d_pad - d)))

    nd = d_pad // td
    nk = n_pad // tn

    # ---- pass 1: BatchNorm statistics (pure streaming; big blocks) ---------
    tn1 = n_pad if n_pad <= 1024 else (1024 if n_pad % 1024 == 0 else 512)
    td1 = d_pad if d_pad <= 1024 else (1024 if d_pad % 1024 == 0 else 512)
    nd1 = d_pad // td1
    nk1 = n_pad // tn1

    stat_spec = pl.BlockSpec((1, td1), lambda dj, k: (0, dj))
    mu1, istd1, mu2, istd2 = pl.pallas_call(
        functools.partial(_bn_stats_kernel, n_real=n),
        grid=(nd1, nk1),
        in_specs=[pl.BlockSpec((tn1, td1), lambda dj, k: (k, dj)),
                  pl.BlockSpec((tn1, td1), lambda dj, k: (k, dj))],
        out_specs=[stat_spec] * 4,
        out_shape=[jax.ShapeDtypeStruct((1, d_pad), jnp.float32)] * 4,
        scratch_shapes=[pltpu.VMEM((1, td1), jnp.float32) for _ in range(4)],
        compiler_params=pltpu.CompilerParams(
            dimension_semantics=("parallel", "arbitrary"),
            vmem_limit_bytes=_VMEM_LIMIT_BYTES),
    )(z1, z2)

    # ---- pass 2: streamed normalize + Gram accumulation + loss epilogue ----
    # Pre-cast the streamed operands when the MXU dtype is narrower than the
    # stored dtype: halves pass-2 HBM traffic at the cost of one cast pass.
    if mxu_dtype.itemsize < jnp.dtype(z1.dtype).itemsize:
        z1_p2 = z1.astype(mxu_dtype)
        z2_p2 = z2.astype(mxu_dtype)
    else:
        z1_p2, z2_p2 = z1, z2

    itemsize_p2 = jnp.dtype(z1_p2.dtype).itemsize
    z1_resident = (nd > 1
                   and 2 * n_pad * td * itemsize_p2 <= _RESIDENT_SLAB_BYTES)

    if z1_resident:
        # Slab fetched once per i (block index independent of j and k).
        z1_spec = pl.BlockSpec((n_pad, td), lambda i, j, k: (0, i))
    else:
        z1_spec = pl.BlockSpec((tn, td), lambda i, j, k: (k, i))

    partials = pl.pallas_call(
        functools.partial(
            _bt_corr_kernel, lambda_bt=float(lambda_bt), n_real=n, d_real=d,
            tn=tn, td=td, mxu_dtype=mxu_dtype, z1_resident=z1_resident,
            has_row_pad=has_row_pad),
        grid=(nd, nd, nk),
        in_specs=[
            z1_spec,                                         # z1 slab / tile
            pl.BlockSpec((tn, td), lambda i, j, k: (k, j)),  # z2 tile
            pl.BlockSpec((1, td), lambda i, j, k: (0, i)),   # mu1
            pl.BlockSpec((1, td), lambda i, j, k: (0, i)),   # inv_std1
            pl.BlockSpec((1, td), lambda i, j, k: (0, j)),   # mu2
            pl.BlockSpec((1, td), lambda i, j, k: (0, j)),   # inv_std2
        ],
        out_specs=pl.BlockSpec((1, 1, 1, 1), lambda i, j, k: (i, j, 0, 0)),
        out_shape=jax.ShapeDtypeStruct((nd, nd, 1, 1), jnp.float32),
        scratch_shapes=[pltpu.VMEM((td, td), jnp.float32)],
        compiler_params=pltpu.CompilerParams(
            dimension_semantics=("parallel", "parallel", "arbitrary"),
            vmem_limit_bytes=_VMEM_LIMIT_BYTES),
    )(z1_p2, z2_p2, mu1, istd1, mu2, istd2)

    # Tiny (D/TD)^2 partial-sum reduction; negligible next to the kernel work.
    return jnp.sum(partials)


# ---------------------------------------------------------------------------
# Pure-JAX reference mirroring the PyTorch module.
# ---------------------------------------------------------------------------
def _reference_bt_loss(z1, z2, lambda_bt):
    n = z1.shape[0]

    def bn(z):
        z = z.astype(jnp.float32)
        mu = jnp.mean(z, axis=0, keepdims=True)
        var = jnp.mean((z - mu) ** 2, axis=0, keepdims=True)
        return (z - mu) / jnp.sqrt(var + EPS)

    c = bn(z1).T @ bn(z2) / n
    eye = jnp.eye(c.shape[0], dtype=c.dtype)
    sq = (c - eye) ** 2
    return jnp.sum(jnp.where(eye > 0, sq, sq * lambda_bt))


if __name__ == "__main__":
    lambda_bt = 0.005
    key = jax.random.PRNGKey(0)
    k1, k2, k3, k4, k5, k6 = jax.random.split(key, 6)

    # 1) Module-sized problem (projector_hidden[-1] = 32): single grid step.
    z1 = jax.random.normal(k1, (8, 32), dtype=jnp.float32)
    z2 = jax.random.normal(k2, (8, 32), dtype=jnp.float32)
    loss = jax.block_until_ready(bt_loss(z1, z2, lambda_bt))
    ref = jax.block_until_ready(_reference_bt_loss(z1, z2, lambda_bt))
    assert jnp.allclose(loss, ref, rtol=1e-4, atol=1e-4), (loss, ref)

    # 2) Multi-tile shape: feature tiles (nd > 1), batch tiles (nk > 1),
    #    row + column padding, resident z1 slab, per-tile diagonal fix-up.
    w1 = jax.random.normal(k3, (600, 1100), dtype=jnp.float32)
    w2 = jax.random.normal(k4, (600, 1100), dtype=jnp.float32)
    loss2 = jax.block_until_ready(bt_loss(w1, w2, lambda_bt))
    ref2 = jax.block_until_ready(_reference_bt_loss(w1, w2, lambda_bt))
    assert jnp.allclose(loss2, ref2, rtol=1e-3, atol=1e-2), (loss2, ref2)

    # 3) TD = 1024 path (D % 1024 == 0), exercising the large feature tile.
    v1 = jax.random.normal(k5, (300, 2048), dtype=jnp.float32)
    v2 = jax.random.normal(k6, (300, 2048), dtype=jnp.float32)
    loss3 = jax.block_until_ready(bt_loss(v1, v2, lambda_bt))
    ref3 = jax.block_until_ready(_reference_bt_loss(v1, v2, lambda_bt))
    assert jnp.allclose(loss3, ref3, rtol=1e-3, atol=1e-2), (loss3, ref3)

    # 4) bf16 MXU operands (pre-cast in HBM) with f32 accumulation.
    loss4 = jax.block_until_ready(
        bt_loss(w1, w2, lambda_bt, mxu_dtype=jnp.bfloat16))
    assert jnp.allclose(loss4, ref2, rtol=2e-2, atol=2e-2), (loss4, ref2)

    print("KERNEL_OK")
</pallas_src>

<mosaic_0001>
module attributes {stable_mosaic.version = 11 : i64} {
  func.func @_bn_stats_kernel(%arg0: i32, %arg1: i32, %arg2: memref<16x32xf32, #tpu.memory_space<vmem>>, %arg3: memref<16x32xf32, #tpu.memory_space<vmem>>, %arg4: memref<1x32xf32, #tpu.memory_space<vmem>>, %arg5: memref<1x32xf32, #tpu.memory_space<vmem>>, %arg6: memref<1x32xf32, #tpu.memory_space<vmem>>, %arg7: memref<1x32xf32, #tpu.memory_space<vmem>>, %arg8: memref<1x32xf32, #tpu.memory_space<vmem>>, %arg9: memref<1x32xf32, #tpu.memory_space<vmem>>, %arg10: memref<1x32xf32, #tpu.memory_space<vmem>>, %arg11: memref<1x32xf32, #tpu.memory_space<vmem>>) attributes {dimension_semantics = [#tpu.dimension_semantics<parallel>, #tpu.dimension_semantics<arbitrary>], iteration_bounds = array<i64: 1, 1>, scalar_prefetch = 0 : i64, scratch_operands = 4 : i64, tpu.core_type = #tpu.core_type<tc>, window_params = [{transform_indices = @transform_0, window_bounds = array<i64: 16, 32>}, {transform_indices = @transform_1, window_bounds = array<i64: 16, 32>}, {transform_indices = @transform_2, window_bounds = array<i64: 1, 32>}, {transform_indices = @transform_3, window_bounds = array<i64: 1, 32>}, {transform_indices = @transform_4, window_bounds = array<i64: 1, 32>}, {transform_indices = @transform_5, window_bounds = array<i64: 1, 32>}]} {
    %c0_i32 = arith.constant 0 : i32
    %0 = arith.cmpi eq, %arg1, %c0_i32 : i32
    %1 = arith.extui %0 : i1 to i32
    %c0_i32_0 = arith.constant 0 : i32
    %2 = arith.cmpi ne, %1, %c0_i32_0 : i32
    scf.if %2 {
      %cst_25 = arith.constant 0.000000e+00 : f32
      %30 = vector.broadcast %cst_25 : f32 to vector<1x32xf32>
      %c0_26 = arith.constant 0 : index
      %c0_27 = arith.constant 0 : index
      %31 = vector.load %arg8[%c0_26, %c0_27] : memref<1x32xf32, #tpu.memory_space<vmem>>, vector<1x32xf32>
      tpu.vector_store %arg8[%c0_26, %c0_27], %30 {strides = array<i32>} : memref<1x32xf32, #tpu.memory_space<vmem>>, vector<1x32xf32>,
      %cst_28 = arith.constant 0.000000e+00 : f32
      %32 = vector.broadcast %cst_28 : f32 to vector<1x32xf32>
      %c0_29 = arith.constant 0 : index
      %c0_30 = arith.constant 0 : index
      %33 = vector.load %arg9[%c0_29, %c0_30] : memref<1x32xf32, #tpu.memory_space<vmem>>, vector<1x32xf32>
      tpu.vector_store %arg9[%c0_29, %c0_30], %32 {strides = array<i32>} : memref<1x32xf32, #tpu.memory_space<vmem>>, vector<1x32xf32>,
      %cst_31 = arith.constant 0.000000e+00 : f32
      %34 = vector.broadcast %cst_31 : f32 to vector<1x32xf32>
      %c0_32 = arith.constant 0 : index
      %c0_33 = arith.constant 0 : index
      %35 = vector.load %arg10[%c0_32, %c0_33] : memref<1x32xf32, #tpu.memory_space<vmem>>, vector<1x32xf32>
      tpu.vector_store %arg10[%c0_32, %c0_33], %34 {strides = array<i32>} : memref<1x32xf32, #tpu.memory_space<vmem>>, vector<1x32xf32>,
      %cst_34 = arith.constant 0.000000e+00 : f32
      %36 = vector.broadcast %cst_34 : f32 to vector<1x32xf32>
      %c0_35 = arith.constant 0 : index
      %c0_36 = arith.constant 0 : index
      %37 = vector.load %arg11[%c0_35, %c0_36] : memref<1x32xf32, #tpu.memory_space<vmem>>, vector<1x32xf32>
      tpu.vector_store %arg11[%c0_35, %c0_36], %36 {strides = array<i32>} : memref<1x32xf32, #tpu.memory_space<vmem>>, vector<1x32xf32>,
    } else {
    }
    %c0 = arith.constant 0 : index
    %c0_1 = arith.constant 0 : index
    %3 = vector.load %arg2[%c0, %c0_1] : memref<16x32xf32, #tpu.memory_space<vmem>>, vector<16x32xf32>
    %c0_2 = arith.constant 0 : index
    %c0_3 = arith.constant 0 : index
    %4 = vector.load %arg3[%c0_2, %c0_3] : memref<16x32xf32, #tpu.memory_space<vmem>>, vector<16x32xf32>
    %c0_4 = arith.constant 0 : index
    %c0_5 = arith.constant 0 : index
    %5 = vector.load %arg8[%c0_4, %c0_5] : memref<1x32xf32, #tpu.memory_space<vmem>>, vector<1x32xf32>
    %cst = arith.constant dense<0.000000e+00> : vector<32xf32>
    %6 = vector.multi_reduction <add>, %3, %cst [0] : vector<16x32xf32> to vector<32xf32>
    %7 = vector.shape_cast %6 : vector<32xf32> to vector<1x32xf32>
    %8 = arith.addf %5, %7 : vector<1x32xf32>
    %c0_6 = arith.constant 0 : index
    %c0_7 = arith.constant 0 : index
    %9 = vector.load %arg8[%c0_6, %c0_7] : memref<1x32xf32, #tpu.memory_space<vmem>>, vector<1x32xf32>
    tpu.vector_store %arg8[%c0_6, %c0_7], %8 {strides = array<i32>} : memref<1x32xf32, #tpu.memory_space<vmem>>, vector<1x32xf32>,
    %c0_8 = arith.constant 0 : index
    %c0_9 = arith.constant 0 : index
    %10 = vector.load %arg9[%c0_8, %c0_9] : memref<1x32xf32, #tpu.memory_space<vmem>>, vector<1x32xf32>
    %11 = arith.mulf %3, %3 : vector<16x32xf32>
    %cst_10 = arith.constant dense<0.000000e+00> : vector<32xf32>
    %12 = vector.multi_reduction <add>, %11, %cst_10 [0] : vector<16x32xf32> to vector<32xf32>
    %13 = vector.shape_cast %12 : vector<32xf32> to vector<1x32xf32>
    %14 = arith.addf %10, %13 : vector<1x32xf32>
    %c0_11 = arith.constant 0 : index
    %c0_12 = arith.constant 0 : index
    %15 = vector.load %arg9[%c0_11, %c0_12] : memref<1x32xf32, #tpu.memory_space<vmem>>, vector<1x32xf32>
    tpu.vector_store %arg9[%c0_11, %c0_12], %14 {strides = array<i32>} : memref<1x32xf32, #tpu.memory_space<vmem>>, vector<1x32xf32>,
    %c0_13 = arith.constant 0 : index
    %c0_14 = arith.constant 0 : index
    %16 = vector.load %arg10[%c0_13, %c0_14] : memref<1x32xf32, #tpu.memory_space<vmem>>, vector<1x32xf32>
    %cst_15 = arith.constant dense<0.000000e+00> : vector<32xf32>
    %17 = vector.multi_reduction <add>, %4, %cst_15 [0] : vector<16x32xf32> to vector<32xf32>
    %18 = vector.shape_cast %17 : vector<32xf32> to vector<1x32xf32>
    %19 = arith.addf %16, %18 : vector<1x32xf32>
    %c0_16 = arith.constant 0 : index
    %c0_17 = arith.constant 0 : index
    %20 = vector.load %arg10[%c0_16, %c0_17] : memref<1x32xf32, #tpu.memory_space<vmem>>, vector<1x32xf32>
    tpu.vector_store %arg10[%c0_16, %c0_17], %19 {strides = array<i32>} : memref<1x32xf32, #tpu.memory_space<vmem>>, vector<1x32xf32>,
    %c0_18 = arith.constant 0 : index
    %c0_19 = arith.constant 0 : index
    %21 = vector.load %arg11[%c0_18, %c0_19] : memref<1x32xf32, #tpu.memory_space<vmem>>, vector<1x32xf32>
    %22 = arith.mulf %4, %4 : vector<16x32xf32>
    %cst_20 = arith.constant dense<0.000000e+00> : vector<32xf32>
    %23 = vector.multi_reduction <add>, %22, %cst_20 [0] : vector<16x32xf32> to vector<32xf32>
    %24 = vector.shape_cast %23 : vector<32xf32> to vector<1x32xf32>
    %25 = arith.addf %21, %24 : vector<1x32xf32>
    %c0_21 = arith.constant 0 : index
    %c0_22 = arith.constant 0 : index
    %26 = vector.load %arg11[%c0_21, %c0_22] : memref<1x32xf32, #tpu.memory_space<vmem>>, vector<1x32xf32>
    tpu.vector_store %arg11[%c0_21, %c0_22], %25 {strides = array<i32>} : memref<1x32xf32, #tpu.memory_space<vmem>>, vector<1x32xf32>,
    %c0_i32_23 = arith.constant 0 : i32
    %27 = arith.cmpi eq, %arg1, %c0_i32_23 : i32
    %28 = arith.extui %27 : i1 to i32
    %c0_i32_24 = arith.constant 0 : i32
    %29 = arith.cmpi ne, %28, %c0_i32_24 : i32
    scf.if %29 {
      %c0_25 = arith.constant 0 : index
      %c0_26 = arith.constant 0 : index
      %30 = vector.load %arg8[%c0_25, %c0_26] : memref<1x32xf32, #tpu.memory_space<vmem>>, vector<1x32xf32>
      %cst_27 = arith.constant 1.250000e-01 : f32
      %31 = vector.broadcast %cst_27 : f32 to vector<1x32xf32>
      %32 = arith.mulf %30, %31 : vector<1x32xf32>
      %c0_28 = arith.constant 0 : index
      %c0_29 = arith.constant 0 : index
      %33 = vector.load %arg10[%c0_28, %c0_29] : memref<1x32xf32, #tpu.memory_space<vmem>>, vector<1x32xf32>
      %cst_30 = arith.constant 1.250000e-01 : f32
      %34 = vector.broadcast %cst_30 : f32 to vector<1x32xf32>
      %35 = arith.mulf %33, %34 : vector<1x32xf32>
      %c0_31 = arith.constant 0 : index
      %c0_32 = arith.constant 0 : index
      %36 = vector.load %arg9[%c0_31, %c0_32] : memref<1x32xf32, #tpu.memory_space<vmem>>, vector<1x32xf32>
      %cst_33 = arith.constant 1.250000e-01 : f32
      %37 = vector.broadcast %cst_33 : f32 to vector<1x32xf32>
      %38 = arith.mulf %36, %37 : vector<1x32xf32>
      %39 = arith.mulf %32, %32 : vector<1x32xf32>
      %40 = arith.subf %38, %39 : vector<1x32xf32>
      %cst_34 = arith.constant 0.000000e+00 : f32
      %41 = vector.broadcast %cst_34 : f32 to vector<1x32xf32>
      %42 = arith.maximumf %40, %41 : vector<1x32xf32>
      %c0_35 = arith.constant 0 : index
      %c0_36 = arith.constant 0 : index
      %43 = vector.load %arg11[%c0_35, %c0_36] : memref<1x32xf32, #tpu.memory_space<vmem>>, vector<1x32xf32>
      %cst_37 = arith.constant 1.250000e-01 : f32
      %44 = vector.broadcast %cst_37 : f32 to vector<1x32xf32>
      %45 = arith.mulf %43, %44 : vector<1x32xf32>
      %46 = arith.mulf %35, %35 : vector<1x32xf32>
      %47 = arith.subf %45, %46 : vector<1x32xf32>
      %cst_38 = arith.constant 0.000000e+00 : f32
      %48 = vector.broadcast %cst_38 : f32 to vector<1x32xf32>
      %49 = arith.maximumf %47, %48 : vector<1x32xf32>
      %c0_39 = arith.constant 0 : index
      %c0_40 = arith.constant 0 : index
      %50 = vector.load %arg4[%c0_39, %c0_40] : memref<1x32xf32, #tpu.memory_space<vmem>>, vector<1x32xf32>
      tpu.vector_store %arg4[%c0_39, %c0_40], %32 {strides = array<i32>} : memref<1x32xf32, #tpu.memory_space<vmem>>, vector<1x32xf32>,
      %cst_41 = arith.constant 9.99999974E-6 : f32
      %51 = vector.broadcast %cst_41 : f32 to vector<1x32xf32>
      %52 = arith.addf %42, %51 : vector<1x32xf32>
      %53 = math.rsqrt %52 : vector<1x32xf32>
      %c0_42 = arith.constant 0 : index
      %c0_43 = arith.constant 0 : index
      %54 = vector.load %arg5[%c0_42, %c0_43] : memref<1x32xf32, #tpu.memory_space<vmem>>, vector<1x32xf32>
      tpu.vector_store %arg5[%c0_42, %c0_43], %53 {strides = array<i32>} : memref<1x32xf32, #tpu.memory_space<vmem>>, vector<1x32xf32>,
      %c0_44 = arith.constant 0 : index
      %c0_45 = arith.constant 0 : index
      %55 = vector.load %arg6[%c0_44, %c0_45] : memref<1x32xf32, #tpu.memory_space<vmem>>, vector<1x32xf32>
      tpu.vector_store %arg6[%c0_44, %c0_45], %35 {strides = array<i32>} : memref<1x32xf32, #tpu.memory_space<vmem>>, vector<1x32xf32>,
      %cst_46 = arith.constant 9.99999974E-6 : f32
      %56 = vector.broadcast %cst_46 : f32 to vector<1x32xf32>
      %57 = arith.addf %49, %56 : vector<1x32xf32>
      %58 = math.rsqrt %57 : vector<1x32xf32>
      %c0_47 = arith.constant 0 : index
      %c0_48 = arith.constant 0 : index
      %59 = vector.load %arg7[%c0_47, %c0_48] : memref<1x32xf32, #tpu.memory_space<vmem>>, vector<1x32xf32>
      tpu.vector_store %arg7[%c0_47, %c0_48], %58 {strides = array<i32>} : memref<1x32xf32, #tpu.memory_space<vmem>>, vector<1x32xf32>,
    } else {
    }
    return
  }
  func.func @transform_0(%arg0: i32, %arg1: i32) -> (i32, i32) {
    %c0_i32 = arith.constant 0 : i32
    return %arg1, %arg0 : i32, i32
  }
  func.func @transform_1(%arg0: i32, %arg1: i32) -> (i32, i32) {
    %c0_i32 = arith.constant 0 : i32
    return %arg1, %arg0 : i32, i32
  }
  func.func @transform_2(%arg0: i32, %arg1: i32) -> (i32, i32) {
    %c0_i32 = arith.constant 0 : i32
    %c0_i32_0 = arith.constant 0 : i32
    return %c0_i32, %arg0 : i32, i32
  }
  func.func @transform_3(%arg0: i32, %arg1: i32) -> (i32, i32) {
    %c0_i32 = arith.constant 0 : i32
    %c0_i32_0 = arith.constant 0 : i32
    return %c0_i32, %arg0 : i32, i32
  }
  func.func @transform_4(%arg0: i32, %arg1: i32) -> (i32, i32) {
    %c0_i32 = arith.constant 0 : i32
    %c0_i32_0 = arith.constant 0 : i32
    return %c0_i32, %arg0 : i32, i32
  }
  func.func @transform_5(%arg0: i32, %arg1: i32) -> (i32, i32) {
    %c0_i32 = arith.constant 0 : i32
    %c0_i32_0 = arith.constant 0 : i32
    return %c0_i32, %arg0 : i32, i32
  }
}

</mosaic_0001>

<bundles_post_ra>
// kernel: tpu_custom_call.1
= control target key start
LH: loop header
LB: loop body
LE: loop exit
PB: predicated region body
PF: predicated region fallthrough
CT: control target
= control target key end

     0   :  { %11 = vsyncpa [#allocation7], 0  ;;  %s497_s0 = inlined_call_operand.hbm [shape: f32[16,32], index: 0, kind: input, shape index: {}]   ;;  %s498_s1 = inlined_call_operand.hbm [shape: f32[16,32], index: 1, kind: input, shape index: {}]   ;;  %s499_s2 = inlined_call_operand.hbm [shape: f32[1,32], index: 2, kind: output, shape index: {0}]   ;;  %s500_s3 = inlined_call_operand.hbm [shape: f32[1,32], index: 3, kind: output, shape index: {1}]   ;;  %s501_s4 = inlined_call_operand.hbm [shape: f32[1,32], index: 4, kind: output, shape index: {2}]   ;;  %s502_s5 = inlined_call_operand.hbm [shape: f32[1,32], index: 5, kind: output, shape index: {3}]  }
   0x1   :  { %12 = vsyncpa [#allocation10], 0 }
   0x2   :  { %13 = vsyncpa [#allocation8], 0 }
   0x3   :  { %14 = vsyncpa [#allocation13], 0 }
   0x4   :  { %15 = vsyncpa [#allocation16], 0  ;;  %s350_s18 = smov [#allocation6]   ;;  %s208_s22 = scalar_lea.hbm %s497_s0, 256 }
   0x5   :  { %s21_s19 = sshll.u32 %s350_s18, 4  ;;  %p209_p0 = scmp.ne.s32.totalorder %s497_s0, %s208_s22  ;;  %s22_s19 = int_to_ptr.vmem [resolvable:$true] %s21_s19 }
   0x6   :  { %p212_p1 = scmp.lt.u32.totalorder %s208_s22, %s497_s0 }
   0x8   :  { %p214_p2 = pnand %p212_p1, %p209_p0 }
   0xa   :  { %217 = shalt.err (!%p214_p2)
}
   0xb   :  { %s218_s27 = scalar_lea.vmem %s22_s19, 256  ;;  %p223_p4 = scmp.lt.s32.totalorder %s22_s19, %s22_s19 }
   0xc   :  { %p219_p3 = scmp.ne.s32.totalorder %s22_s19, %s218_s27  ;;  %p224_p5 = scmp.lt.s32.totalorder %s218_s27, %s218_s27 }
   0xe   :  { %p225_p6 = por %p224_p5, %p223_p4 }
  0x10   :  { %p226_p7 = pnand %p225_p6, %p219_p3 }
  0x12   :  { %229 = shalt.err (!%p226_p7)
}
  0x13   :  { %s351_s28 = smov 128   ;;  %s352_s29 = smov 8  }
  0x14   :  { %27 = dma.hbm_to_vmem [thread:$0]  %s497_s0, 256, %s22_s19, [#allocation7], %s351_s28, %s351_s28, %s352_s29  }
  0x15   :  { %s353_s7 = smov [#allocation9]   ;;  %s230_s11 = scalar_lea.hbm %s498_s1, 256 }
  0x16   :  { %s33_s8 = sshll.u32 %s353_s7, 4  ;;  %p231_p8 = scmp.ne.s32.totalorder %s498_s1, %s230_s11  ;;  %s34_s8 = int_to_ptr.vmem [resolvable:$true] %s33_s8 }
  0x17   :  { %p234_p9 = scmp.lt.u32.totalorder %s230_s11, %s498_s1 }
  0x19   :  { %p236_p10 = pnand %p234_p9, %p231_p8 }
  0x1b   :  { %239 = shalt.err (!%p236_p10)
}
  0x1c   :  { %s240_s16 = scalar_lea.vmem %s34_s8, 256  ;;  %p245_p12 = scmp.lt.s32.totalorder %s34_s8, %s34_s8 }
  0x1d   :  { %p241_p11 = scmp.ne.s32.totalorder %s34_s8, %s240_s16  ;;  %p246_p13 = scmp.lt.s32.totalorder %s240_s16, %s240_s16 }
  0x1f   :  { %p247_p0 = por %p246_p13, %p245_p12 }
  0x21   :  { %p248_p1 = pnand %p247_p0, %p241_p11 }
  0x23   :  { %251 = shalt.err (!%p248_p1)
}
  0x24   :  { %39 = dma.hbm_to_vmem [thread:$0]  %s498_s1, 256, %s34_s8, [#allocation10], %s351_s28, %s351_s28, %s352_s29  }
  0x25   :  { %340 = dma.done.wait [#allocation7], 256  }
  0x26   :  { %341 = vsyncadd [#allocation7], 4294967040 }
  0x27   :  { %342 = dma.done.wait [#allocation10], 256  }
  0x28   :  { %343 = vsyncadd [#allocation10], 4294967040  ;;  %vm50_vm0 = vcmask 253952   ;;  %v354_v0 = vmov 0.0   ;;  %vm60_vm1 = vcmask 261120   ;;  %v55_v1 = vld [vmem:[#allocation6] sm:$0xff] }
  0x29   :  { %51 = vst.msk [vmem:[#allocation2] sm:$0x1] %vm50_vm0, %v354_v0  ;;  %52 = vst.msk [vmem:[#allocation3] sm:$0x1] %vm50_vm0, %v354_v0  ;;  %v56_v2 = vld [vmem:[#allocation6 + $0x8] sm:$0xff]  ;;  %v57_v3 = vld [vmem:[#allocation9] sm:$0xff]  ;;  %v74_v8 = vmul.f32 %v55_v1, %v55_v1 }
  0x2a   :  { %53 = vst.msk [vmem:[#allocation4] sm:$0x1] %vm50_vm0, %v354_v0  ;;  %54 = vst.msk [vmem:[#allocation5] sm:$0x1] %vm50_vm0, %v354_v0  ;;  %v61_v4 = vsel %vm60_vm1, %v55_v1, 0.0  ;;  %v62_v5 = vsel %vm60_vm1, %v56_v2, 0.0  ;;  %v75_v11 = vmul.f32 %v56_v2, %v56_v2  ;;  %v100_v12 = vmul.f32 %v57_v3, %v57_v3 }
  0x2b   :  { %v58_v6 = vld [vmem:[#allocation9 + $0x8] sm:$0xff]  ;;  %v88_v7 = vsel %vm60_vm1, %v57_v3, 0.0  ;;  %v63_v9 = vadd.f32 %v62_v5, %v61_v4  ;;  %v76_v14 = vsel %vm60_vm1, %v74_v8, 0.0  ;;  %s355_s1 = smov [#allocation11]  }
  0x2c   :  { %v89_v10 = vsel %vm60_vm1, %v58_v6, 0.0  ;;  %v101_v15 = vmul.f32 %v58_v6, %v58_v6  ;;  %v77_v17 = vsel %vm60_vm1, %v75_v11, 0.0  ;;  %v102_v18 = vsel %vm60_vm1, %v100_v12, 0.0  ;;  %s144_s18 = sshll.u32 %s355_s1, 4  ;;  %s145_s18 = int_to_ptr.vmem [resolvable:$true] %s144_s18 }
  0x2d   :  { %v90_v13 = vadd.f32 %v89_v10, %v88_v7  ;;  %v64_v16 = vrot.slane %v63_v9, 4  ;;  %v78_v20 = vadd.f32 %v77_v17, %v76_v14  ;;  %s252_s19 = scalar_lea.vmem %s145_s18, 16  ;;  %s256_s20 = scalar_lea.vmem %s145_s18, 32 }
  0x2e   :  { %v103_v21 = vsel %vm60_vm1, %v101_v15, 0.0  ;;  %p253_p2 = scmp.ne.s32.totalorder %s145_s18, %s252_s19  ;;  %p257_p3 = scmp.lt.s32.totalorder %s145_s18, %s145_s18 }
  0x2f   :  { %v91_v19 = vrot.slane %v90_v13, 4  ;;  %v65_v22 = vadd.f32 %v64_v16, %v63_v9  ;;  %v104_v23 = vadd.f32 %v103_v21, %v102_v18  ;;  %v79_v25 = vrot.slane %v78_v20, 4  ;;  %p258_p4 = scmp.lt.s32.totalorder %s256_s20, %s252_s19 }
  0x30   :  { %v59_v36 = vld [vmem:[#allocation2] sm:$0x1]  ;;  %v73_v45 = vld [vmem:[#allocation3] sm:$0x1] }
  0x31   :  { %v92_v24 = vadd.f32 %v91_v19, %v90_v13  ;;  %v66_v26 = vrot.slane %v65_v22, 2  ;;  %v105_v27 = vrot.slane %v104_v23, 4  ;;  %v80_v29 = vadd.f32 %v79_v25, %v78_v20  ;;  %v87_v40 = vld [vmem:[#allocation4] sm:$0x1]  ;;  %v99_v49 = vld [vmem:[#allocation5] sm:$0x1]  ;;  %p259_p5 = por %p258_p4, %p257_p3 }
  0x33   :  { %v93_v28 = vrot.slane %v92_v24, 2  ;;  %v67_v30 = vadd.f32 %v66_v26, %v65_v22  ;;  %v106_v31 = vadd.f32 %v105_v27, %v104_v23  ;;  %v81_v33 = vrot.slane %v80_v29, 2  ;;  %p260_p6 = pnand %p259_p5, %p253_p2 }
  0x35   :  { %v94_v32 = vadd.f32 %v93_v28, %v92_v24  ;;  %v68_v34 = vrot.slane %v67_v30, 1  ;;  %v107_v35 = vrot.slane %v106_v31, 2  ;;  %v82_v38 = vadd.f32 %v81_v33, %v80_v29 }
  0x37   :  { %v95_v37 = vrot.slane %v94_v32, 1  ;;  %v69_v39 = vadd.f32 %v68_v34, %v67_v30  ;;  %v108_v41 = vadd.f32 %v107_v35, %v106_v31  ;;  %v83_v43 = vrot.slane %v82_v38, 1 }
  0x39   :  { %v96_v42 = vadd.f32 %v95_v37, %v94_v32  ;;  %v70_v44 = vadd.f32 %v69_v39, %v59_v36  ;;  %v109_v46 = vrot.slane %v108_v41, 1  ;;  %v84_v48 = vadd.f32 %v83_v43, %v82_v38 }
  0x3b   :  { %v97_v47 = vadd.f32 %v96_v42, %v87_v40  ;;  %72 = vst.msk [vmem:[#allocation2] sm:$0x1] %vm50_vm0, %v70_v44  ;;  %v110_v50 = vadd.f32 %v109_v46, %v108_v41  ;;  %v85_v51 = vadd.f32 %v84_v48, %v73_v45 }
  0x3d   :  { %98 = vst.msk [vmem:[#allocation4] sm:$0x1] %vm50_vm0, %v97_v47  ;;  %v111_v52 = vadd.f32 %v110_v50, %v99_v49  ;;  %86 = vst.msk [vmem:[#allocation3] sm:$0x1] %vm50_vm0, %v85_v51 }
  0x3f   :  { %112 = vst.msk [vmem:[#allocation5] sm:$0x1] %vm50_vm0, %v111_v52 }
  0x42   :  { %v116_v53 = vld [vmem:[#allocation2] sm:$0x1] }
  0x43   :  { %v117_v54 = vmul.f32 0.125, %v116_v53 }
  0x44   :  { %v118_v55 = vld [vmem:[#allocation4] sm:$0x1]  ;;  %v120_v57 = vld [vmem:[#allocation3] sm:$0x1] }
  0x45   :  { %v119_v56 = vmul.f32 0.125, %v118_v55  ;;  %v122_v58 = vmul.f32 %v117_v54, %v117_v54  ;;  %130 = vst.msk [vmem:[#allocation11] sm:$0x1] %vm50_vm0, %v117_v54  ;;  %v121_v59 = vmul.f32 0.125, %v120_v57 }
  0x46   :  { %v125_v60 = vld [vmem:[#allocation5] sm:$0x1] }
  0x47   :  { %v127_v61 = vmul.f32 %v119_v56, %v119_v56  ;;  %134 = vst.msk [vmem:[#allocation14] sm:$0x1] %vm50_vm0, %v119_v56 }
  0x48   :  { %263 = shalt.err (!%p260_p6)
}
  0x49   :  { %s264_s23 = scalar_lea.hbm %s499_s2, 16 }
  0x4a   :  { %p265_p7 = scmp.ne.s32.totalorder %s499_s2, %s264_s23  ;;  %p268_p8 = scmp.lt.u32.totalorder %s264_s23, %s499_s2 }
  0x4c   :  { %p270_p9 = pnand %p268_p8, %p265_p7 }
  0x4e   :  { %273 = shalt.err (!%p270_p9)
}
  0x4f   :  { %147 = dma.vmem_to_hbm [thread:$0]  %s145_s18, 16, %s499_s2, [#allocation8]   ;;  %v126_v62 = vmul.f32 0.125, %v125_v60  ;;  %v123_v63 = vsub.f32 %v121_v59, %v122_v58 }
  0x50   :  { %s356_s30 = smov [#allocation12]   ;;  %s357_s7 = smov [#allocation14]  }
  0x51   :  { %v128_v0 = vsub.f32 %v126_v62, %v127_v61  ;;  %v124_v1 = vmax.f32 %v123_v63, 0.0  ;;  %s154_s6 = sshll.u32 %s356_s30, 4  ;;  %s164_s8 = sshll.u32 %s357_s7, 4  ;;  %s155_s6 = int_to_ptr.vmem [resolvable:$true] %s154_s6  ;;  %s443_s8 = int_to_ptr.vmem [resolvable:$true] %s164_s8 }
  0x52   :  { %s358_s9 = smov [#allocation15]   ;;  %s274_s2 = scalar_lea.vmem %s155_s6, 16 }
  0x53   :  { %v129_v2 = vmax.f32 %v128_v0, 0.0  ;;  %v131_v3 = vadd.f32 1e-05, %v124_v1  ;;  %s174_s10 = sshll.u32 %s358_s9, 4  ;;  %p275_p10 = scmp.ne.s32.totalorder %s155_s6, %s274_s2  ;;  %s446_s10 = int_to_ptr.vmem [resolvable:$true] %s174_s10 }
  0x54   :  { %s278_s11 = scalar_lea.vmem %s155_s6, 32  ;;  %p279_p11 = scmp.lt.s32.totalorder %s155_s6, %s155_s6 }
  0x55   :  { %v135_v4 = vadd.f32 1e-05, %v129_v2  ;;  %204 = vrsqrt.f32 %v131_v3  ;;  %p280_p12 = scmp.lt.s32.totalorder %s278_s11, %s274_s2 }
  0x57   :  { %206 = vrsqrt.f32 %v135_v4  ;;  %p281_p13 = por %p280_p12, %p279_p11 }
  0x59   :  { %p282_p0 = pnand %p281_p13, %p275_p10 }
  0x5f   :  { %v205_v5 = vpop.eup %204 }
  0x60   :  { %133 = vst.msk [vmem:[#allocation12] sm:$0x1] %vm50_vm0, %v205_v5 }
  0x61   :  { %v207_v6 = vpop.eup %206 }
  0x62   :  { %137 = vst.msk [vmem:[#allocation15] sm:$0x1] %vm50_vm0, %v207_v6 }
  0x63   :  { %285 = shalt.err (!%p282_p0)
}
  0x64   :  { %s286_s14 = scalar_lea.hbm %s500_s3, 16 }
  0x65   :  { %p287_p1 = scmp.ne.s32.totalorder %s500_s3, %s286_s14  ;;  %p290_p2 = scmp.lt.u32.totalorder %s286_s14, %s500_s3 }
  0x67   :  { %p292_p3 = pnand %p290_p2, %p287_p1 }
  0x69   :  { %295 = shalt.err (!%p292_p3)
}
  0x6a   :  { %157 = dma.vmem_to_hbm [thread:$0]  %s155_s6, 16, %s500_s3, [#allocation13]  }
  0x6b   :  { %s296_s19 = scalar_lea.vmem %s443_s8, 16  ;;  %s300_s20 = scalar_lea.vmem %s443_s8, 32 }
  0x6c   :  { %p297_p4 = scmp.ne.s32.totalorder %s443_s8, %s296_s19  ;;  %p301_p5 = scmp.lt.s32.totalorder %s443_s8, %s443_s8 }
  0x6d   :  { %p302_p6 = scmp.lt.s32.totalorder %s300_s20, %s296_s19 }
  0x6f   :  { %p303_p7 = por %p302_p6, %p301_p5 }
  0x71   :  { %p304_p8 = pnand %p303_p7, %p297_p4 }
  0x73   :  { %307 = shalt.err (!%p304_p8)
}
  0x74   :  { %s308_s23 = scalar_lea.hbm %s501_s4, 16 }
  0x75   :  { %p309_p9 = scmp.ne.s32.totalorder %s501_s4, %s308_s23  ;;  %p312_p10 = scmp.lt.u32.totalorder %s308_s23, %s501_s4 }
  0x77   :  { %p314_p11 = pnand %p312_p10, %p309_p9 }
  0x79   :  { %317 = shalt.err (!%p314_p11)
}
  0x7a   :  { %167 = dma.vmem_to_hbm [thread:$0]  %s443_s8, 16, %s501_s4, [#allocation13]  }
  0x7b   :  { %s318_s29 = scalar_lea.vmem %s446_s10, 16  ;;  %s322_s30 = scalar_lea.vmem %s446_s10, 32 }
  0x7c   :  { %p319_p12 = scmp.ne.s32.totalorder %s446_s10, %s318_s29  ;;  %p323_p13 = scmp.lt.s32.totalorder %s446_s10, %s446_s10 }
  0x7d   :  { %p324_p0 = scmp.lt.s32.totalorder %s322_s30, %s318_s29 }
  0x7f   :  { %p325_p1 = por %p324_p0, %p323_p13 }
  0x81   :  { %p326_p2 = pnand %p325_p1, %p319_p12 }
  0x83   :  { %329 = shalt.err (!%p326_p2)
}
  0x84   :  { %s330_s9 = scalar_lea.hbm %s502_s5, 16 }
  0x85   :  { %p331_p3 = scmp.ne.s32.totalorder %s502_s5, %s330_s9  ;;  %p334_p4 = scmp.lt.u32.totalorder %s330_s9, %s502_s5 }
  0x87   :  { %p336_p5 = pnand %p334_p4, %p331_p3 }
  0x89   :  { %339 = shalt.err (!%p336_p5)
}
  0x8a   :  { %177 = dma.vmem_to_hbm [thread:$0]  %s446_s10, 16, %s502_s5, [#allocation16]  }
  0x8b   :  { %344 = dma.done.wait [#allocation8], 16  }
  0x8c   :  { %345 = vsyncadd [#allocation8], 4294967280 }
  0x8d   :  { %346 = dma.done.wait [#allocation13], 32  }
  0x8e   :  { %347 = vsyncadd [#allocation13], 4294967264 }
  0x8f   :  { %348 = dma.done.wait [#allocation16], 16  }
  0x90   :  { %349 = vsyncadd [#allocation16], 4294967280 }
  0x91   :  { %190 = vsyncpa [#allocation7], 1 }
  0x92   :  { %191 = vsyncpa [#allocation10], 1 }
  0x93   :  { %192 = vsyncpa [#allocation8], 1 }
  0x94   :  { %193 = vsyncpa [#allocation13], 1 }
  0x95   :  { %194 = vsyncpa [#allocation16], 1 }

</bundles_post_ra>
